<compile_context>
chip_gen: v6e
topology: v6e:2x2x1
jax: 0.10.0
libtpu: 0.0.40
codegen_flags: <defaults>
</compile_context>

<pallas_src>
import functools

import jax
import jax.numpy as jnp
from jax.experimental import pallas as pl
from jax.experimental.pallas import tpu as pltpu


def _round_up(n, m):
    return (n + m - 1) // m * m


def _pad_dim(d):
    # Lane-dense features. 256-align larger dims so v6e/v7x's 256x256 MXU is
    # fully fed (256 is also a multiple of 128, so still legal on v5e).
    return _round_up(d, 256) if d >= 256 else _round_up(d, 128)


def _single_buffer_mode():
    """Probe pl.Buffered / pipeline_mode support (older jax lacks it)."""
    try:
        pl.BlockSpec((8, 128), lambda i: (0, 0), pipeline_mode=pl.Buffered(1))
        return pl.Buffered(1)
    except (TypeError, AttributeError):
        return None


def _physical_vmem_bytes():
    try:
        return int(pltpu.get_tpu_info().vmem_capacity_bytes)
    except Exception:
        return 64 << 20  # conservative (v7x-sized) default


def generator_kernel(x_ref,
                     w1, b1, w2, b2, w3, b3, w4, b4, w5, b5,
                     o_ref):
    """Fused 5-layer MLP (Linear+ReLU x4, Linear) on one batch tile.

    Matmuls run in bf16 on the MXU with f32 accumulation; bias add + ReLU are
    done in f32 on the VPU, then cast back to bf16 for the next MXU pass.
    """
    def layer(h, w_ref, b_ref):
        acc = jnp.dot(h, w_ref[...], preferred_element_type=jnp.float32)
        return jnp.maximum(acc + b_ref[...], 0.0).astype(h.dtype)

    h = x_ref[...]
    h = layer(h, w1, b1)
    h = layer(h, w2, b2)
    h = layer(h, w3, b3)
    h = layer(h, w4, b4)
    out = jnp.dot(h, w5[...], preferred_element_type=jnp.float32) + b5[...]
    o_ref[...] = out.astype(o_ref.dtype)


def make_generator_forward(params, *, batch_tile=512, compute_dtype=jnp.bfloat16):
    """Prepares (pads/casts, once) the Generator weights and returns a jitted
    forward function  x:[B, input_dim] f32  ->  [B, output_dim] f32.
    """
    input_dim, hidden = params["w1"].shape
    output_dim = params["w5"].shape[1]

    in_p, hid_p, out_p = _pad_dim(input_dim), _pad_dim(hidden), _pad_dim(output_dim)

    # ---- one-time weight/bias pad + cast (hoisted off the per-call path) ----
    dims = ([(input_dim, hidden, in_p, hid_p)]
            + [(hidden, hidden, hid_p, hid_p)] * 3
            + [(hidden, output_dim, hid_p, out_p)])
    flat = []
    for idx, (kin, kout, kin_p, kout_p) in enumerate(dims, start=1):
        w_pad = jnp.zeros((kin_p, kout_p), compute_dtype).at[:kin, :kout].set(
            params[f"w{idx}"].astype(compute_dtype))
        b_pad = jnp.zeros((1, kout_p), jnp.float32).at[:, :kout].set(
            params[f"b{idx}"].astype(jnp.float32))
        flat += [w_pad, b_pad]
    flat = tuple(jax.device_put(p) for p in flat)

    weight_mode = _single_buffer_mode()
    param_mult = 1 if weight_mode is not None else 2      # resident vs double-buffered
    param_bytes = sum(int(p.size) * p.dtype.itemsize for p in flat)
    vmem_cap = int(_physical_vmem_bytes() * 0.8)           # headroom for compiler scratch

    requested_tile = int(batch_tile)

    def _tiling(B):
        if B < 128:
            # Small batches are overhead-bound: tile tracks B (16-row bf16 pack).
            tile = _round_up(max(min(B, requested_tile), 1), 16)
        else:
            tile = max(128, _round_up(min(requested_tile, B), 128))
        b_pad = _round_up(B, tile)
        # Give the batch axis >=2 grid steps when there is enough work, so
        # dimension_semantics=("parallel",) can shard across v7x's 2 TCs.
        if B >= 256 and b_pad // tile < 2:
            tile = max(128, _round_up(tile // 2, 128))
            b_pad = _round_up(B, tile)
        return tile, b_pad

    @jax.jit
    def _fwd(x, *flat_args):
        B = x.shape[0]
        tile, B_pad = _tiling(B)
        grid = (B_pad // tile,)

        tile_io_bytes = tile * (in_p * 2 + out_p * 4)      # in bf16, out f32, double-buffered
        needed = param_mult * param_bytes + 2 * tile_io_bytes + (4 << 20)
        if needed > vmem_cap:
            raise ValueError(
                f"resident-weight Generator kernel needs ~{needed >> 20} MiB VMEM, "
                f"over the {vmem_cap >> 20} MiB budget")
        vmem_limit = int(min(vmem_cap, max(16 << 20, needed)))

        x_pad = jnp.zeros((B_pad, in_p), compute_dtype).at[:B, :input_dim].set(
            x.astype(compute_dtype))

        def const_spec(shape):
            if weight_mode is None:
                return pl.BlockSpec(shape, lambda i: (0, 0))
            return pl.BlockSpec(shape, lambda i: (0, 0), pipeline_mode=weight_mode)

        in_specs = [pl.BlockSpec((tile, in_p), lambda i: (i, 0))]
        in_specs += [const_spec(p.shape) for p in flat_args]
        out_spec = pl.BlockSpec((tile, out_p), lambda i: (i, 0))

        flops = 2 * B_pad * (in_p * hid_p + 3 * hid_p * hid_p + hid_p * out_p)
        bytes_accessed = (int(x_pad.size) * 2 + param_bytes + B_pad * out_p * 4)

        out_pad = pl.pallas_call(
            generator_kernel,
            out_shape=jax.ShapeDtypeStruct((B_pad, out_p), jnp.float32),
            grid_spec=pltpu.PrefetchScalarGridSpec(
                num_scalar_prefetch=0,
                grid=grid,
                in_specs=in_specs,
                out_specs=out_spec,
            ),
            compiler_params=pltpu.CompilerParams(
                dimension_semantics=("parallel",),
                vmem_limit_bytes=vmem_limit,
            ),
            cost_estimate=pl.CostEstimate(
                flops=int(flops),
                transcendentals=0,
                bytes_accessed=int(bytes_accessed)),
        )(x_pad, *flat_args)

        # Slice/cast stay fused under this jit -> no extra HBM round-trip.
        return out_pad[:B, :output_dim].astype(x.dtype)

    @functools.wraps(_fwd)
    def forward(x):
        return _fwd(x, *flat)

    return forward


def init_generator_params(key, input_dim, output_dim):
    """Deterministic init mirroring the PyTorch module's layer shapes."""
    hidden = input_dim // 2
    dims = [(input_dim, hidden), (hidden, hidden), (hidden, hidden),
            (hidden, hidden), (hidden, output_dim)]
    params = {}
    for idx, (fan_in, fan_out) in enumerate(dims, start=1):
        key, kw, kb = jax.random.split(key, 3)
        bound = 1.0 / jnp.sqrt(fan_in)
        # stored as [in, out] (transpose of torch's [out, in])
        params[f"w{idx}"] = jax.random.uniform(
            kw, (fan_in, fan_out), jnp.float32, -bound, bound)
        params[f"b{idx}"] = jax.random.uniform(
            kb, (1, fan_out), jnp.float32, -bound, bound)
    return params


def generator_ref(x, params, compute_dtype=jnp.bfloat16):
    """Pure-JAX reference using the same bf16-weight / f32-accum numerics."""
    h = x.astype(compute_dtype)
    for idx in range(1, 5):
        acc = jnp.dot(h, params[f"w{idx}"].astype(compute_dtype),
                      preferred_element_type=jnp.float32) + params[f"b{idx}"]
        h = jnp.maximum(acc, 0.0).astype(compute_dtype)
    out = jnp.dot(h, params["w5"].astype(compute_dtype),
                  preferred_element_type=jnp.float32) + params["b5"]
    return out.astype(x.dtype)


if __name__ == "__main__":
    key = jax.random.PRNGKey(0)
    input_dim, output_dim, batch = 32, 32, 16

    kx, kp = jax.random.split(key)
    x = jax.random.uniform(kx, (batch, input_dim), jnp.float32, 0.0, 1.0)
    params = init_generator_params(kp, input_dim, output_dim)

    forward = make_generator_forward(params)
    out = jax.block_until_ready(forward(x))

    ref = generator_ref(x, params)
    assert out.shape == (batch, output_dim)
    assert jnp.allclose(out, ref, atol=5e-3, rtol=5e-3), "mismatch vs reference"

    print("KERNEL_OK")
</pallas_src>

<mosaic_0001>
module attributes {stable_mosaic.version = 11 : i64} {
  func.func @generator_kernel(%arg0: i32, %arg1: memref<16x128xbf16, #tpu.memory_space<vmem>>, %arg2: memref<128x128xbf16, #tpu.memory_space<vmem>>, %arg3: memref<1x128xf32, #tpu.memory_space<vmem>>, %arg4: memref<128x128xbf16, #tpu.memory_space<vmem>>, %arg5: memref<1x128xf32, #tpu.memory_space<vmem>>, %arg6: memref<128x128xbf16, #tpu.memory_space<vmem>>, %arg7: memref<1x128xf32, #tpu.memory_space<vmem>>, %arg8: memref<128x128xbf16, #tpu.memory_space<vmem>>, %arg9: memref<1x128xf32, #tpu.memory_space<vmem>>, %arg10: memref<128x128xbf16, #tpu.memory_space<vmem>>, %arg11: memref<1x128xf32, #tpu.memory_space<vmem>>, %arg12: memref<16x128xf32, #tpu.memory_space<vmem>>) attributes {dimension_semantics = [#tpu.dimension_semantics<parallel>], iteration_bounds = array<i64: 1>, scalar_prefetch = 0 : i64, scratch_operands = 0 : i64, tpu.core_type = #tpu.core_type<tc>, window_params = [{transform_indices = @transform_0, window_bounds = array<i64: 16, 128>}, {pipeline_mode = #tpu.pipeline_mode<synchronous>, transform_indices = @transform_1, window_bounds = array<i64: 128, 128>}, {pipeline_mode = #tpu.pipeline_mode<synchronous>, transform_indices = @transform_2, window_bounds = array<i64: 1, 128>}, {pipeline_mode = #tpu.pipeline_mode<synchronous>, transform_indices = @transform_3, window_bounds = array<i64: 128, 128>}, {pipeline_mode = #tpu.pipeline_mode<synchronous>, transform_indices = @transform_4, window_bounds = array<i64: 1, 128>}, {pipeline_mode = #tpu.pipeline_mode<synchronous>, transform_indices = @transform_5, window_bounds = array<i64: 128, 128>}, {pipeline_mode = #tpu.pipeline_mode<synchronous>, transform_indices = @transform_6, window_bounds = array<i64: 1, 128>}, {pipeline_mode = #tpu.pipeline_mode<synchronous>, transform_indices = @transform_7, window_bounds = array<i64: 128, 128>}, {pipeline_mode = #tpu.pipeline_mode<synchronous>, transform_indices = @transform_8, window_bounds = array<i64: 1, 128>}, {pipeline_mode = #tpu.pipeline_mode<synchronous>, transform_indices = @transform_9, window_bounds = array<i64: 128, 128>}, {pipeline_mode = #tpu.pipeline_mode<synchronous>, transform_indices = @transform_10, window_bounds = array<i64: 1, 128>}, {transform_indices = @transform_11, window_bounds = array<i64: 16, 128>}]} {
    %c0 = arith.constant 0 : index
    %c0_0 = arith.constant 0 : index
    %0 = vector.load %arg1[%c0, %c0_0] : memref<16x128xbf16, #tpu.memory_space<vmem>>, vector<16x128xbf16>
    %c0_1 = arith.constant 0 : index
    %c0_2 = arith.constant 0 : index
    %1 = vector.load %arg2[%c0_1, %c0_2] : memref<128x128xbf16, #tpu.memory_space<vmem>>, vector<128x128xbf16>
    %cst = arith.constant dense<0.000000e+00> : vector<16x128xf32>
    %2 = tpu.matmul %0, %1, %cst {dimension_numbers = #tpu.dot_dimension_numbers<[1], [0], [0], [1], [0, 0, 1, 1], [], []>} : vector<16x128xbf16>, vector<128x128xbf16>, vector<16x128xf32> -> vector<16x128xf32>
    %c0_3 = arith.constant 0 : index
    %c0_4 = arith.constant 0 : index
    %3 = vector.load %arg3[%c0_3, %c0_4] : memref<1x128xf32, #tpu.memory_space<vmem>>, vector<1x128xf32>
    %4 = vector.broadcast %3 : vector<1x128xf32> to vector<16x128xf32>
    %5 = arith.addf %2, %4 : vector<16x128xf32>
    %cst_5 = arith.constant 0.000000e+00 : f32
    %6 = vector.broadcast %cst_5 : f32 to vector<16x128xf32>
    %7 = arith.maximumf %5, %6 : vector<16x128xf32>
    %8 = arith.truncf %7 : vector<16x128xf32> to vector<16x128xbf16>
    %c0_6 = arith.constant 0 : index
    %c0_7 = arith.constant 0 : index
    %9 = vector.load %arg4[%c0_6, %c0_7] : memref<128x128xbf16, #tpu.memory_space<vmem>>, vector<128x128xbf16>
    %cst_8 = arith.constant dense<0.000000e+00> : vector<16x128xf32>
    %10 = tpu.matmul %8, %9, %cst_8 {dimension_numbers = #tpu.dot_dimension_numbers<[1], [0], [0], [1], [0, 0, 1, 1], [], []>} : vector<16x128xbf16>, vector<128x128xbf16>, vector<16x128xf32> -> vector<16x128xf32>
    %c0_9 = arith.constant 0 : index
    %c0_10 = arith.constant 0 : index
    %11 = vector.load %arg5[%c0_9, %c0_10] : memref<1x128xf32, #tpu.memory_space<vmem>>, vector<1x128xf32>
    %12 = vector.broadcast %11 : vector<1x128xf32> to vector<16x128xf32>
    %13 = arith.addf %10, %12 : vector<16x128xf32>
    %cst_11 = arith.constant 0.000000e+00 : f32
    %14 = vector.broadcast %cst_11 : f32 to vector<16x128xf32>
    %15 = arith.maximumf %13, %14 : vector<16x128xf32>
    %16 = arith.truncf %15 : vector<16x128xf32> to vector<16x128xbf16>
    %c0_12 = arith.constant 0 : index
    %c0_13 = arith.constant 0 : index
    %17 = vector.load %arg6[%c0_12, %c0_13] : memref<128x128xbf16, #tpu.memory_space<vmem>>, vector<128x128xbf16>
    %cst_14 = arith.constant dense<0.000000e+00> : vector<16x128xf32>
    %18 = tpu.matmul %16, %17, %cst_14 {dimension_numbers = #tpu.dot_dimension_numbers<[1], [0], [0], [1], [0, 0, 1, 1], [], []>} : vector<16x128xbf16>, vector<128x128xbf16>, vector<16x128xf32> -> vector<16x128xf32>
    %c0_15 = arith.constant 0 : index
    %c0_16 = arith.constant 0 : index
    %19 = vector.load %arg7[%c0_15, %c0_16] : memref<1x128xf32, #tpu.memory_space<vmem>>, vector<1x128xf32>
    %20 = vector.broadcast %19 : vector<1x128xf32> to vector<16x128xf32>
    %21 = arith.addf %18, %20 : vector<16x128xf32>
    %cst_17 = arith.constant 0.000000e+00 : f32
    %22 = vector.broadcast %cst_17 : f32 to vector<16x128xf32>
    %23 = arith.maximumf %21, %22 : vector<16x128xf32>
    %24 = arith.truncf %23 : vector<16x128xf32> to vector<16x128xbf16>
    %c0_18 = arith.constant 0 : index
    %c0_19 = arith.constant 0 : index
    %25 = vector.load %arg8[%c0_18, %c0_19] : memref<128x128xbf16, #tpu.memory_space<vmem>>, vector<128x128xbf16>
    %cst_20 = arith.constant dense<0.000000e+00> : vector<16x128xf32>
    %26 = tpu.matmul %24, %25, %cst_20 {dimension_numbers = #tpu.dot_dimension_numbers<[1], [0], [0], [1], [0, 0, 1, 1], [], []>} : vector<16x128xbf16>, vector<128x128xbf16>, vector<16x128xf32> -> vector<16x128xf32>
    %c0_21 = arith.constant 0 : index
    %c0_22 = arith.constant 0 : index
    %27 = vector.load %arg9[%c0_21, %c0_22] : memref<1x128xf32, #tpu.memory_space<vmem>>, vector<1x128xf32>
    %28 = vector.broadcast %27 : vector<1x128xf32> to vector<16x128xf32>
    %29 = arith.addf %26, %28 : vector<16x128xf32>
    %cst_23 = arith.constant 0.000000e+00 : f32
    %30 = vector.broadcast %cst_23 : f32 to vector<16x128xf32>
    %31 = arith.maximumf %29, %30 : vector<16x128xf32>
    %32 = arith.truncf %31 : vector<16x128xf32> to vector<16x128xbf16>
    %c0_24 = arith.constant 0 : index
    %c0_25 = arith.constant 0 : index
    %33 = vector.load %arg10[%c0_24, %c0_25] : memref<128x128xbf16, #tpu.memory_space<vmem>>, vector<128x128xbf16>
    %cst_26 = arith.constant dense<0.000000e+00> : vector<16x128xf32>
    %34 = tpu.matmul %32, %33, %cst_26 {dimension_numbers = #tpu.dot_dimension_numbers<[1], [0], [0], [1], [0, 0, 1, 1], [], []>} : vector<16x128xbf16>, vector<128x128xbf16>, vector<16x128xf32> -> vector<16x128xf32>
    %c0_27 = arith.constant 0 : index
    %c0_28 = arith.constant 0 : index
    %35 = vector.load %arg11[%c0_27, %c0_28] : memref<1x128xf32, #tpu.memory_space<vmem>>, vector<1x128xf32>
    %36 = vector.broadcast %35 : vector<1x128xf32> to vector<16x128xf32>
    %37 = arith.addf %34, %36 : vector<16x128xf32>
    %c0_29 = arith.constant 0 : index
    %c0_30 = arith.constant 0 : index
    %38 = vector.load %arg12[%c0_29, %c0_30] : memref<16x128xf32, #tpu.memory_space<vmem>>, vector<16x128xf32>
    tpu.vector_store %arg12[%c0_29, %c0_30], %37 {strides = array<i32>} : memref<16x128xf32, #tpu.memory_space<vmem>>, vector<16x128xf32>,
    return
  }
  func.func @transform_0(%arg0: i32) -> (i32, i32) {
    %c0_i32 = arith.constant 0 : i32
    %c0_i32_0 = arith.constant 0 : i32
    return %arg0, %c0_i32 : i32, i32
  }
  func.func @transform_1(%arg0: i32) -> (i32, i32) {
    %c0_i32 = arith.constant 0 : i32
    %c0_i32_0 = arith.constant 0 : i32
    %c0_i32_1 = arith.constant 0 : i32
    return %c0_i32, %c0_i32_0 : i32, i32
  }
  func.func @transform_2(%arg0: i32) -> (i32, i32) {
    %c0_i32 = arith.constant 0 : i32
    %c0_i32_0 = arith.constant 0 : i32
    %c0_i32_1 = arith.constant 0 : i32
    return %c0_i32, %c0_i32_0 : i32, i32
  }
  func.func @transform_3(%arg0: i32) -> (i32, i32) {
    %c0_i32 = arith.constant 0 : i32
    %c0_i32_0 = arith.constant 0 : i32
    %c0_i32_1 = arith.constant 0 : i32
    return %c0_i32, %c0_i32_0 : i32, i32
  }
  func.func @transform_4(%arg0: i32) -> (i32, i32) {
    %c0_i32 = arith.constant 0 : i32
    %c0_i32_0 = arith.constant 0 : i32
    %c0_i32_1 = arith.constant 0 : i32
    return %c0_i32, %c0_i32_0 : i32, i32
  }
  func.func @transform_5(%arg0: i32) -> (i32, i32) {
    %c0_i32 = arith.constant 0 : i32
    %c0_i32_0 = arith.constant 0 : i32
    %c0_i32_1 = arith.constant 0 : i32
    return %c0_i32, %c0_i32_0 : i32, i32
  }
  func.func @transform_6(%arg0: i32) -> (i32, i32) {
    %c0_i32 = arith.constant 0 : i32
    %c0_i32_0 = arith.constant 0 : i32
    %c0_i32_1 = arith.constant 0 : i32
    return %c0_i32, %c0_i32_0 : i32, i32
  }
  func.func @transform_7(%arg0: i32) -> (i32, i32) {
    %c0_i32 = arith.constant 0 : i32
    %c0_i32_0 = arith.constant 0 : i32
    %c0_i32_1 = arith.constant 0 : i32
    return %c0_i32, %c0_i32_0 : i32, i32
  }
  func.func @transform_8(%arg0: i32) -> (i32, i32) {
    %c0_i32 = arith.constant 0 : i32
    %c0_i32_0 = arith.constant 0 : i32
    %c0_i32_1 = arith.constant 0 : i32
    return %c0_i32, %c0_i32_0 : i32, i32
  }
  func.func @transform_9(%arg0: i32) -> (i32, i32) {
    %c0_i32 = arith.constant 0 : i32
    %c0_i32_0 = arith.constant 0 : i32
    %c0_i32_1 = arith.constant 0 : i32
    return %c0_i32, %c0_i32_0 : i32, i32
  }
  func.func @transform_10(%arg0: i32) -> (i32, i32) {
    %c0_i32 = arith.constant 0 : i32
    %c0_i32_0 = arith.constant 0 : i32
    %c0_i32_1 = arith.constant 0 : i32
    return %c0_i32, %c0_i32_0 : i32, i32
  }
  func.func @transform_11(%arg0: i32) -> (i32, i32) {
    %c0_i32 = arith.constant 0 : i32
    %c0_i32_0 = arith.constant 0 : i32
    return %arg0, %c0_i32 : i32, i32
  }
}

</mosaic_0001>

<bundles_post_ra>
// kernel: _fwd.1
= control target key start
LH: loop header
LB: loop body
LE: loop exit
PB: predicated region body
PF: predicated region fallthrough
CT: control target
= control target key end

     0   :  { %16 = vsyncpa [#allocation3], 0  ;;  %s1254_s0 = inlined_call_operand.vmem [shape: bf16[16,128], index: 0, kind: input, shape index: {}]   ;;  %s1255_s1 = inlined_call_operand.hbm [shape: bf16[128,128], index: 1, kind: input, shape index: {}]   ;;  %s1256_s2 = inlined_call_operand.vmem [shape: f32[1,128], index: 2, kind: input, shape index: {}]   ;;  %s1257_s3 = inlined_call_operand.hbm [shape: bf16[128,128], index: 3, kind: input, shape index: {}]   ;;  %s1258_s4 = inlined_call_operand.vmem [shape: f32[1,128], index: 4, kind: input, shape index: {}]   ;;  %s1259_s5 = inlined_call_operand.hbm [shape: bf16[128,128], index: 5, kind: input, shape index: {}]   ;;  %s1260_s6 = inlined_call_operand.vmem [shape: f32[1,128], index: 6, kind: input, shape index: {}]   ;;  %s1261_s7 = inlined_call_operand.hbm [shape: bf16[128,128], index: 7, kind: input, shape index: {}]   ;;  %s1262_s8 = inlined_call_operand.vmem [shape: f32[1,128], index: 8, kind: input, shape index: {}]   ;;  %s1263_s9 = inlined_call_operand.hbm [shape: bf16[128,128], index: 9, kind: input, shape index: {}]   ;;  %s1264_s10 = inlined_call_operand.vmem [shape: f32[1,128], index: 10, kind: input, shape index: {}]   ;;  %s1265_s11 = inlined_call_operand.hbm [shape: f32[16,128], index: 11, kind: output, shape index: {}]  }
   0x1   :  { %17 = vsyncpa [#allocation6], 0 }
   0x2   :  { %18 = vsyncpa [#allocation9], 0 }
   0x3   :  { %19 = vsyncpa [#allocation4], 0  ;;  %s1081_s17 = smov [#allocation5]   ;;  %s1082_s19 = smov [#allocation8]  }
   0x4   :  { %s41_s18 = sshll.u32 %s1081_s17, 4  ;;  %s69_s20 = sshll.u32 %s1082_s19, 4  ;;  %s42_s18 = int_to_ptr.vmem [resolvable:$true] %s41_s18  ;;  %s70_s20 = int_to_ptr.vmem [resolvable:$true] %s69_s20 }
   0x5   :  { %s961_s21 = scalar_lea.vmem %s42_s18, 1024  ;;  %p966_p1 = scmp.lt.s32.totalorder %s42_s18, %s42_s18 }
   0x6   :  { %p962_p0 = scmp.ne.s32.totalorder %s42_s18, %s961_s21  ;;  %p967_p2 = scmp.lt.s32.totalorder %s961_s21, %s961_s21 }
   0x8   :  { %p968_p3 = por %p967_p2, %p966_p1 }
   0xa   :  { %p969_p4 = pnand %p968_p3, %p962_p0 }
   0xc   :  { %972 = shalt.err (!%p969_p4)
}
   0xd   :  { %s1083_s22 = smov 64   ;;  %s1084_s23 = smov 4  }
   0xe   :  { %47 = dma.hbm_to_vmem [thread:$0]  %s1257_s3, 1024, %s42_s18, [#allocation6], %s1083_s22, %s1083_s22, %s1084_s23  }
   0xf   :  { %s981_s26 = scalar_lea.vmem %s70_s20, 1024  ;;  %p986_p6 = scmp.lt.s32.totalorder %s70_s20, %s70_s20 }
  0x10   :  { %p982_p5 = scmp.ne.s32.totalorder %s70_s20, %s981_s26  ;;  %p987_p7 = scmp.lt.s32.totalorder %s981_s26, %s981_s26 }
  0x12   :  { %p988_p8 = por %p987_p7, %p986_p6 }
  0x14   :  { %p989_p9 = pnand %p988_p8, %p982_p5 }
  0x16   :  { %992 = shalt.err (!%p989_p9)
}
  0x17   :  { %75 = dma.hbm_to_vmem [thread:$0]  %s1261_s7, 1024, %s70_s20, [#allocation9], %s1083_s22, %s1083_s22, %s1084_s23  }
  0x18   :  { %s1085_s29 = smov [#allocation2]   ;;  %s1086_s12 = smov [#allocation7]  }
  0x19   :  { %s27_s30 = sshll.u32 %s1085_s29, 4  ;;  %s55_s13 = sshll.u32 %s1086_s12, 4  ;;  %s28_s30 = int_to_ptr.vmem [resolvable:$true] %s27_s30  ;;  %s56_s13 = int_to_ptr.vmem [resolvable:$true] %s55_s13 }
  0x1a   :  { %s1001_s3 = scalar_lea.vmem %s28_s30, 1024  ;;  %p1006_p11 = scmp.lt.s32.totalorder %s28_s30, %s28_s30 }
  0x1b   :  { %p1002_p10 = scmp.ne.s32.totalorder %s28_s30, %s1001_s3  ;;  %p1007_p12 = scmp.lt.s32.totalorder %s1001_s3, %s1001_s3 }
  0x1d   :  { %p1008_p13 = por %p1007_p12, %p1006_p11 }
  0x1f   :  { %p1009_p0 = pnand %p1008_p13, %p1002_p10 }
  0x21   :  { %1012 = shalt.err (!%p1009_p0)
}
  0x22   :  { %33 = dma.hbm_to_vmem [thread:$0]  %s1255_s1, 1024, %s28_s30, [#allocation3], %s1083_s22, %s1083_s22, %s1084_s23  }
  0x23   :  { %s1021_s7 = scalar_lea.vmem %s56_s13, 1024  ;;  %p1026_p2 = scmp.lt.s32.totalorder %s56_s13, %s56_s13 }
  0x24   :  { %p1022_p1 = scmp.ne.s32.totalorder %s56_s13, %s1021_s7  ;;  %p1027_p3 = scmp.lt.s32.totalorder %s1021_s7, %s1021_s7 }
  0x26   :  { %p1028_p4 = por %p1027_p3, %p1026_p2 }
  0x28   :  { %p1029_p5 = pnand %p1028_p4, %p1022_p1 }
  0x2a   :  { %1032 = shalt.err (!%p1029_p5)
}
  0x2b   :  { %61 = dma.hbm_to_vmem [thread:$0]  %s1259_s5, 1024, %s56_s13, [#allocation6], %s1083_s22, %s1083_s22, %s1084_s23  }
  0x2c   :  { %s1087_s18 = smov [#allocation10]  }
  0x2d   :  { %s83_s19 = sshll.u32 %s1087_s18, 4  ;;  %s84_s19 = int_to_ptr.vmem [resolvable:$true] %s83_s19 }
  0x2e   :  { %s1041_s20 = scalar_lea.vmem %s84_s19, 1024  ;;  %p1046_p7 = scmp.lt.s32.totalorder %s84_s19, %s84_s19 }
  0x2f   :  { %p1042_p6 = scmp.ne.s32.totalorder %s84_s19, %s1041_s20  ;;  %p1047_p8 = scmp.lt.s32.totalorder %s1041_s20, %s1041_s20 }
  0x31   :  { %p1048_p9 = por %p1047_p8, %p1046_p7 }
  0x33   :  { %p1049_p10 = pnand %p1048_p9, %p1042_p6 }
  0x35   :  { %1052 = shalt.err (!%p1049_p10)
}
  0x36   :  { %89 = dma.hbm_to_vmem [thread:$0]  %s1263_s9, 1024, %s84_s19, [#allocation9], %s1083_s22, %s1083_s22, %s1084_s23  }
  0x37   :  { %1073 = dma.done.wait [#allocation3], 1024  }
  0x38   :  { %1074 = vsyncadd [#allocation3], 4294966272 }
  0x39   :  { %1075 = dma.done.wait [#allocation6], 2048  }
  0x3a   :  { %1076 = vsyncadd [#allocation6], 4294965248 }
  0x3b   :  { %1077 = dma.done.wait [#allocation9], 2048  }
  0x3c   :  { %1078 = vsyncadd [#allocation9], 4294965248  ;;  %v1088_v0 = vmov 0.0   ;;  %vm1089_vm0 = vmmov 0   ;;  %v912_v1 = vld [vmem:[#allocation2 + $0x38] sm:$0xff]   ;;  %v913_v2 = vld [vmem:[#allocation2 + $0x30] sm:$0xff]  }
  0x3d   :  { %800 = vmatprep.subr.bf16.mxu0 %v1088_v0  ;;  %816 = vmatprep.mubr.msk.bf16.mxu0 %vm1089_vm0, %v1088_v0  ;;  %v914_v3 = vld [vmem:[#allocation2 + $0x28] sm:$0xff]   ;;  %v921_v4 = vld [vmem:[#allocation5 + $0x38] sm:$0xff]   ;;  %v915_v5 = vld [vmem:[#allocation2 + $0x20] sm:$0xff]   ;;  %s1090_s28 = smov [#allocation11]  }
  0x3e   :  { %820 = vmatprep.subr.bf16.mxu1 %v1088_v0  ;;  %836 = vmatprep.mubr.msk.bf16.mxu1 %vm1089_vm0, %v1088_v0  ;;  %v922_v6 = vld [vmem:[#allocation5 + $0x30] sm:$0xff]   ;;  %v916_v7 = vld [vmem:[#allocation2 + $0x18] sm:$0xff]   ;;  %v923_v8 = vld [vmem:[#allocation5 + $0x28] sm:$0xff]   ;;  %s695_s29 = sshll.u32 %s1090_s28, 4  ;;  %s696_s29 = int_to_ptr.vmem [resolvable:$true] %s695_s29 }
  0x3f   :  { %801 = vmatpush3.bf16.msra.mxu0 %v912_v1  ;;  %821 = vmatpush3.bf16.msra.mxu1 %v921_v4  ;;  %v917_v9 = vld [vmem:[#allocation2 + $0x10] sm:$0xff]   ;;  %v924_v10 = vld [vmem:[#allocation5 + $0x20] sm:$0xff]   ;;  %v918_v11 = vld [vmem:[#allocation2 + $0x8] sm:$0xff]   ;;  %p1058_p12 = scmp.lt.s32.totalorder %s696_s29, %s696_s29 }
  0x40   :  { %802 = vmatprep.subr.bf16.mxu0 %v1088_v0  ;;  %822 = vmatprep.subr.bf16.mxu1 %v1088_v0  ;;  %v925_v12 = vld [vmem:[#allocation5 + $0x18] sm:$0xff]   ;;  %v919_v13 = vld [vmem:[#allocation2] sm:$0xff]   ;;  %v926_v15 = vld [vmem:[#allocation5 + $0x10] sm:$0xff]  }
  0x41   :  { %v920_v14 = vld [vmem:[%s1254_s0] sm:$0xff]   ;;  %v927_v16 = vld [vmem:[#allocation5 + $0x8] sm:$0xff]   ;;  %v929_v18 = vld [vmem:[#allocation7 + $0x38] sm:$0xff]  }
  0x42   :  { %v928_v17 = vld [vmem:[#allocation5] sm:$0xff]   ;;  %v930_v19 = vld [vmem:[#allocation7 + $0x30] sm:$0xff]   ;;  %v931_v20 = vld [vmem:[#allocation7 + $0x28] sm:$0xff]  }
  0x43   :  { %803 = vmatpush3.bf16.msra.mxu0 %v913_v2  ;;  %823 = vmatpush3.bf16.msra.mxu1 %v922_v6  ;;  %v932_v21 = vld [vmem:[#allocation7 + $0x20] sm:$0xff]   ;;  %v933_v22 = vld [vmem:[#allocation7 + $0x18] sm:$0xff]   ;;  %v934_v33 = vld [vmem:[#allocation7 + $0x10] sm:$0xff]  }
  0x44   :  { %804 = vmatprep.subr.bf16.mxu0 %v1088_v0  ;;  %824 = vmatprep.subr.bf16.mxu1 %v1088_v0  ;;  %v709_v23 = vld [vmem:[%s1256_s2] ss:$0 sm:$0xff]  ;;  %v935_v34 = vld [vmem:[#allocation7 + $0x8] sm:$0xff]   ;;  %v937_v36 = vld [vmem:[#allocation8 + $0x38] sm:$0xff]  }
  0x45   :  { %v936_v35 = vld [vmem:[#allocation7] sm:$0xff]   ;;  %v938_v37 = vld [vmem:[#allocation8 + $0x30] sm:$0xff]   ;;  %v939_v38 = vld [vmem:[#allocation8 + $0x28] sm:$0xff]  }
  0x46   :  { %v940_v39 = vld [vmem:[#allocation8 + $0x20] sm:$0xff]   ;;  %v941_v40 = vld [vmem:[#allocation8 + $0x18] sm:$0xff]   ;;  %v942_v51 = vld [vmem:[#allocation8 + $0x10] sm:$0xff]  }
  0x47   :  { %805 = vmatpush3.bf16.msra.mxu0 %v914_v3  ;;  %825 = vmatpush3.bf16.msra.mxu1 %v923_v8  ;;  %v719_v41 = vld [vmem:[%s1258_s4] ss:$0 sm:$0xff]  ;;  %v943_v52 = vld [vmem:[#allocation8 + $0x8] sm:$0xff]   ;;  %v945_v54 = vld [vmem:[#allocation10 + $0x38] sm:$0xff]  }
  0x48   :  { %806 = vmatprep.subr.bf16.mxu0 %v1088_v0  ;;  %826 = vmatprep.subr.bf16.mxu1 %v1088_v0  ;;  %v944_v53 = vld [vmem:[#allocation8] sm:$0xff]   ;;  %v946_v55 = vld [vmem:[#allocation10 + $0x30] sm:$0xff]   ;;  %v947_v56 = vld [vmem:[#allocation10 + $0x28] sm:$0xff]  }
  0x49   :  { %v948_v57 = vld [vmem:[#allocation10 + $0x20] sm:$0xff]   ;;  %v949_v58 = vld [vmem:[#allocation10 + $0x18] sm:$0xff]   ;;  %v950_v6 = vld [vmem:[#allocation10 + $0x10] sm:$0xff]  }
  0x4a   :  { %v728_v59 = vld [vmem:[%s1260_s6] ss:$0 sm:$0xff] }
  0x4b   :  { %807 = vmatpush3.bf16.msra.mxu0 %v915_v5  ;;  %827 = vmatpush3.bf16.msra.mxu1 %v924_v10  ;;  %v952_v8 = vld [vmem:[#allocation10] sm:$0xff]  }
  0x4c   :  { %808 = vmatprep.subr.bf16.mxu0 %v1088_v0  ;;  %828 = vmatprep.subr.bf16.mxu1 %v1088_v0 }
  0x4f   :  { %809 = vmatpush3.bf16.msra.mxu0 %v916_v7  ;;  %829 = vmatpush3.bf16.msra.mxu1 %v925_v12  ;;  %v951_v7 = vld [vmem:[#allocation10 + $0x8] sm:$0xff]  }
  0x50   :  { %810 = vmatprep.subr.bf16.mxu0 %v1088_v0  ;;  %830 = vmatprep.subr.bf16.mxu1 %v1088_v0 }
  0x53   :  { %811 = vmatpush3.bf16.msra.mxu0 %v917_v9  ;;  %831 = vmatpush3.bf16.msra.mxu1 %v926_v15  ;;  %v737_v9 = vld [vmem:[%s1262_s8] ss:$0 sm:$0xff]  ;;  %s1053_s8 = scalar_lea.vmem %s696_s29, 256 }
  0x54   :  { %812 = vmatprep.subr.bf16.mxu0 %v1088_v0  ;;  %832 = vmatprep.subr.bf16.mxu1 %v1088_v0  ;;  %p1054_p11 = scmp.ne.s32.totalorder %s696_s29, %s1053_s8  ;;  %p1059_p13 = scmp.lt.s32.totalorder %s1053_s8, %s1053_s8 }
  0x56   :  { %p1060_p0 = por %p1059_p13, %p1058_p12 }
  0x57   :  { %813 = vmatpush3.bf16.msra.mxu0 %v918_v11  ;;  %833 = vmatpush3.bf16.msra.mxu1 %v927_v16 }
  0x58   :  { %814 = vmatprep.subr.bf16.mxu0 %v1088_v0  ;;  %834 = vmatprep.subr.bf16.mxu1 %v1088_v0  ;;  %p1061_p1 = pnand %p1060_p0, %p1054_p11 }
  0x5b   :  { %815 = vmatpush3.bf16.msra.mxu0 %v919_v13  ;;  %835 = vmatpush3.bf16.msra.mxu1 %v928_v17 }
  0x5c   :  { %840 = vmatprep.subr.bf16.mxu0 %v1088_v0  ;;  %860 = vmatprep.subr.bf16.mxu1 %v1088_v0 }
  0x5e   :  { %817 = vmatmul.mubr.bf16.vlgmr.msra.gmra.mxu0 %v920_v14 }
  0x5f   :  { %856 = vmatprep.mubr.msk.bf16.mxu0 %vm1089_vm0, %v1088_v0  ;;  %841 = vmatpush3.bf16.msra.mxu0 %v929_v18 }
  0x60   :  { %842 = vmatprep.subr.bf16.mxu0 %v1088_v0 }
  0x63   :  { %843 = vmatpush3.bf16.msra.mxu0 %v930_v19 }
  0x64   :  { %844 = vmatprep.subr.bf16.mxu0 %v1088_v0 }
  0x67   :  { %845 = vmatpush3.bf16.msra.mxu0 %v931_v20 }
  0x68   :  { %846 = vmatprep.subr.bf16.mxu0 %v1088_v0 }
  0x6b   :  { %847 = vmatpush3.bf16.msra.mxu0 %v932_v21 }
  0x6c   :  { %848 = vmatprep.subr.bf16.mxu0 %v1088_v0 }
  0x6f   :  { %849 = vmatpush3.bf16.msra.mxu0 %v933_v22 }
  0x70   :  { %850 = vmatprep.subr.bf16.mxu0 %v1088_v0 }
  0x73   :  { %851 = vmatpush3.bf16.msra.mxu0 %v934_v33 }
  0x74   :  { %852 = vmatprep.subr.bf16.mxu0 %v1088_v0 }
  0x77   :  { %853 = vmatpush3.bf16.msra.mxu0 %v935_v34 }
  0x78   :  { %854 = vmatprep.subr.bf16.mxu0 %v1088_v0 }
  0x7b   :  { %855 = vmatpush3.bf16.msra.mxu0 %v936_v35 }
  0x7c   :  { %880 = vmatprep.subr.bf16.mxu0 %v1088_v0 }
 0x11e   :  { %v221_v24 = vpop.f32.mrf.mxu0 }
 0x11f   :  { %v222_v26 = vadd.f32 %v709_v23, %v221_v24 }
 0x120   :  { %v818_v25 = vpop.f32.mrf.mxu0 }
 0x121   :  { %v228_v30 = vmax.f32 %v222_v26, 0.0 }
 0x122   :  { %v224_v27 = vpop.f32.mrf.mxu0 }
 0x123   :  { %v225_v28 = vadd.f32 %v709_v23, %v224_v27 }
 0x124   :  { %v819_v29 = vpop.f32.mrf.mxu0 }
 0x125   :  { %v229_v31 = vmax.f32 %v225_v28, 0.0 }
 0x127   :  { %v230_v32 = vpack.c.bf16 %v229_v31, %v228_v30 }
 0x129   :  { %837 = vmatmul.mubr.bf16.vlgmr.msra.gmra.mxu1 %v230_v32 }
 0x12a   :  { %876 = vmatprep.mubr.msk.bf16.mxu1 %vm1089_vm0, %v1088_v0  ;;  %861 = vmatpush3.bf16.msra.mxu1 %v937_v36 }
 0x12b   :  { %862 = vmatprep.subr.bf16.mxu1 %v1088_v0 }
 0x12e   :  { %863 = vmatpush3.bf16.msra.mxu1 %v938_v37 }
 0x12f   :  { %864 = vmatprep.subr.bf16.mxu1 %v1088_v0 }
 0x132   :  { %865 = vmatpush3.bf16.msra.mxu1 %v939_v38 }
 0x133   :  { %866 = vmatprep.subr.bf16.mxu1 %v1088_v0 }
 0x136   :  { %867 = vmatpush3.bf16.msra.mxu1 %v940_v39 }
 0x137   :  { %868 = vmatprep.subr.bf16.mxu1 %v1088_v0 }
 0x13a   :  { %869 = vmatpush3.bf16.msra.mxu1 %v941_v40 }
 0x13b   :  { %870 = vmatprep.subr.bf16.mxu1 %v1088_v0 }
 0x13e   :  { %871 = vmatpush3.bf16.msra.mxu1 %v942_v51 }
 0x13f   :  { %872 = vmatprep.subr.bf16.mxu1 %v1088_v0 }
 0x142   :  { %873 = vmatpush3.bf16.msra.mxu1 %v943_v52 }
 0x143   :  { %874 = vmatprep.subr.bf16.mxu1 %v1088_v0 }
 0x146   :  { %875 = vmatpush3.bf16.msra.mxu1 %v944_v53 }
 0x1e9   :  { %v336_v42 = vpop.f32.mrf.mxu1 }
 0x1ea   :  { %v337_v44 = vadd.f32 %v719_v41, %v336_v42 }
 0x1eb   :  { %v838_v43 = vpop.f32.mrf.mxu1 }
 0x1ec   :  { %v343_v48 = vmax.f32 %v337_v44, 0.0 }
 0x1ed   :  { %v339_v45 = vpop.f32.mrf.mxu1 }
 0x1ee   :  { %v340_v46 = vadd.f32 %v719_v41, %v339_v45 }
 0x1ef   :  { %v839_v47 = vpop.f32.mrf.mxu1 }
 0x1f0   :  { %v344_v49 = vmax.f32 %v340_v46, 0.0 }
 0x1f2   :  { %v345_v50 = vpack.c.bf16 %v344_v49, %v343_v48 }
 0x1f4   :  { %857 = vmatmul.mubr.bf16.vlgmr.msra.gmra.mxu0 %v345_v50 }
 0x1f5   :  { %896 = vmatprep.mubr.msk.bf16.mxu0 %vm1089_vm0, %v1088_v0  ;;  %881 = vmatpush3.bf16.msra.mxu0 %v945_v54 }
 0x1f6   :  { %882 = vmatprep.subr.bf16.mxu0 %v1088_v0 }
 0x1f9   :  { %883 = vmatpush3.bf16.msra.mxu0 %v946_v55 }
 0x1fa   :  { %884 = vmatprep.subr.bf16.mxu0 %v1088_v0 }
 0x1fd   :  { %885 = vmatpush3.bf16.msra.mxu0 %v947_v56 }
 0x1fe   :  { %886 = vmatprep.subr.bf16.mxu0 %v1088_v0 }
 0x201   :  { %887 = vmatpush3.bf16.msra.mxu0 %v948_v57 }
 0x202   :  { %888 = vmatprep.subr.bf16.mxu0 %v1088_v0 }
 0x205   :  { %889 = vmatpush3.bf16.msra.mxu0 %v949_v58 }
 0x206   :  { %890 = vmatprep.subr.bf16.mxu0 %v1088_v0 }
 0x209   :  { %891 = vmatpush3.bf16.msra.mxu0 %v950_v6 }
 0x20a   :  { %892 = vmatprep.subr.bf16.mxu0 %v1088_v0 }
 0x20d   :  { %893 = vmatpush3.bf16.msra.mxu0 %v951_v7 }
 0x20e   :  { %894 = vmatprep.subr.bf16.mxu0 %v1088_v0  ;;  %v746_v0 = vld [vmem:[%s1264_s10] ss:$0 sm:$0xff] }
 0x211   :  { %895 = vmatpush3.bf16.msra.mxu0 %v952_v8 }
 0x2b4   :  { %v451_v60 = vpop.f32.mrf.mxu0 }
 0x2b5   :  { %v452_v62 = vadd.f32 %v728_v59, %v451_v60 }
 0x2b6   :  { %v858_v61 = vpop.f32.mrf.mxu0 }
 0x2b7   :  { %v458_v3 = vmax.f32 %v452_v62, 0.0 }
 0x2b8   :  { %v454_v63 = vpop.f32.mrf.mxu0 }
 0x2b9   :  { %v455_v1 = vadd.f32 %v728_v59, %v454_v63 }
 0x2ba   :  { %v859_v2 = vpop.f32.mrf.mxu0 }
 0x2bb   :  { %v459_v4 = vmax.f32 %v455_v1, 0.0 }
 0x2bd   :  { %v460_v5 = vpack.c.bf16 %v459_v4, %v458_v3 }
 0x2bf   :  { %877 = vmatmul.mubr.bf16.vlgmr.msra.gmra.mxu1 %v460_v5 }
 0x37f   :  { %v566_v10 = vpop.f32.mrf.mxu1 }
 0x380   :  { %v567_v12 = vadd.f32 %v737_v9, %v566_v10 }
 0x381   :  { %v878_v11 = vpop.f32.mrf.mxu1 }
 0x382   :  { %v573_v16 = vmax.f32 %v567_v12, 0.0 }
 0x383   :  { %v569_v13 = vpop.f32.mrf.mxu1 }
 0x384   :  { %v570_v14 = vadd.f32 %v737_v9, %v569_v13 }
 0x385   :  { %v879_v15 = vpop.f32.mrf.mxu1 }
 0x386   :  { %v574_v17 = vmax.f32 %v570_v14, 0.0 }
 0x388   :  { %v575_v18 = vpack.c.bf16 %v574_v17, %v573_v16 }
 0x38a   :  { %897 = vmatmul.mubr.bf16.vlgmr.msra.gmra.mxu0 %v575_v18 }
 0x44a   :  { %v681_v19 = vpop.f32.mrf.mxu0 }
 0x44b   :  { %v682_v20 = vadd.f32 %v746_v0, %v681_v19 }
 0x44c   :  { %v898_v21 = vpop.f32.mrf.mxu0 }
 0x44d   :  { %688 = vst [vmem:[#allocation11] sm:$0xff] %v682_v20 }
 0x44e   :  { %v684_v22 = vpop.f32.mrf.mxu0 }
 0x44f   :  { %v685_v23 = vadd.f32 %v746_v0, %v684_v22 }
 0x450   :  { %v899_v24 = vpop.f32.mrf.mxu0 }
 0x451   :  { %689 = vst [vmem:[#allocation11 + $0x8] sm:$0xff] %v685_v23 }
 0x452   :  { %1064 = shalt.err (!%p1061_p1)
}
 0x453   :  { %s1091_s30 = smov 128   ;;  %s1092_s10 = smov 8  }
 0x454   :  { %701 = dma.vmem_to_hbm [thread:$0]  %s696_s29, 256, %s1265_s11, [#allocation4], %s1091_s30, %s1091_s30, %s1092_s10  }
 0x455   :  { %1079 = dma.done.wait [#allocation4], 256  }
 0x456   :  { %1080 = vsyncadd [#allocation4], 4294967040 }
 0x457   :  { %705 = vsyncpa [#allocation3], 1 }
 0x458   :  { %706 = vsyncpa [#allocation6], 1 }
 0x459   :  { %707 = vsyncpa [#allocation9], 1 }
 0x45a   :  { %708 = vsyncpa [#allocation4], 1 }

</bundles_post_ra>
